<compile_context>
chip_gen: v7x
topology: tpu7x:2x2x1
jax: 0.10.0
libtpu: 0.0.40
codegen_flags: <defaults>
</compile_context>

<pallas_src>
import functools

import jax
import jax.numpy as jnp
from jax import lax
from jax.experimental import pallas as pl
from jax.experimental.pallas import tpu as pltpu


def _ln_cf_kernel(x_ref, w_ref, b_ref, o_ref, *, eps: float):
    # x_ref: (C, THW) tile -- channels on sublanes, spatial on lanes.
    # w_ref / b_ref: (C, 1).  Normalization is over axis 0 (channels).
    x = x_ref[...].astype(jnp.float32)
    mean = jnp.mean(x, axis=0, keepdims=True)                    # (1, THW)
    var = jnp.mean(jnp.square(x - mean), axis=0, keepdims=True)  # biased var (matches torch code)
    inv = lax.rsqrt(var + eps)
    w = w_ref[...].astype(jnp.float32)                           # (C, 1) broadcasts over lanes
    b = b_ref[...].astype(jnp.float32)
    # Recompute (x - mean) at the store instead of carrying a centered copy
    # across the variance reduction -> one fewer (C, THW) f32 VMEM temporary,
    # which is the headroom that pays for the bigger DMA block.
    o_ref[...] = ((x - mean) * inv * w + b).astype(o_ref.dtype)


@functools.lru_cache(maxsize=1)
def _tpu_budgets():
    """(target_block_bytes, vmem_limit_bytes) chosen per TPU generation."""
    try:
        vmem_bytes = pltpu.get_tpu_info().vmem_capacity_bytes
    except Exception:
        vmem_bytes = 64 * 1024 * 1024  # conservative: assume v7x-sized VMEM
    if vmem_bytes >= 128 * 1024 * 1024:
        # v5e / v6e: 128 MiB physical VMEM -> big blocks, generous scoped limit.
        return 8 * 1024 * 1024, 96 * 1024 * 1024
    # v7x: 64 MiB per TensorCore -> cap blocks ~6 MiB and leave spill headroom.
    return 6 * 1024 * 1024, 48 * 1024 * 1024


def _pick_spatial_tile(hw: int, c: int, itemsize: int, target_block_bytes: int,
                       n_batch: int, min_grid_steps: int = 8) -> int:
    """Lane tile: full extent if small, else a lane-aligned size chosen so a
    block is roughly `target_block_bytes`, accounting for sublane padding of C
    and the in-kernel f32 temporaries, while keeping enough grid steps for
    megacore sharding + double-buffering."""
    if hw <= 128:
        return hw                                   # full-extent last dim is always legal

    # Sublane packing multiple for the dtype (f32: 8, bf16: 16, int8/fp8: 32).
    sub = max(8, 32 // max(1, itemsize))
    c_pad = ((c + sub - 1) // sub) * sub
    # Size by f32-equivalent bytes (max(itemsize, 4)): the in-kernel math is
    # f32, so element count -- not packed input bytes -- bounds VMEM temps.
    t = max(128, target_block_bytes // max(1, c_pad * max(itemsize, 4)))
    t = min(t, hw)
    t = (t // 128) * 128                            # lane-aligned, >= 128

    # Guarantee enough grid steps: N * cdiv(HW, thw) >= min_grid_steps when
    # possible (v7x megacore sharding + >=3 steps to hide DMA).
    want_cols = max(1, -(-min_grid_steps // max(1, n_batch)))  # cdiv
    if want_cols > 1:
        t_cap = max(128, ((hw // want_cols) // 128) * 128)
        t = min(t, t_cap)
    return max(128, t)


def layernorm_channels_first(x, weight, bias, eps=1e-6):
    """x: (N, C, H, W); weight, bias: (C,). Returns (N, C, H, W)."""
    N, C, H, W = x.shape
    HW = H * W
    itemsize = jnp.dtype(x.dtype).itemsize

    target_block_bytes, vmem_limit_bytes = _tpu_budgets()

    # Free (no-copy) reshapes: NCHW is contiguous.
    x3 = x.reshape(N, C, HW)
    w2 = weight.reshape(C, 1)
    b2 = bias.reshape(C, 1)

    thw = _pick_spatial_tile(HW, C, itemsize, target_block_bytes, N)
    grid = (N, pl.cdiv(HW, thw))

    kernel = functools.partial(_ln_cf_kernel, eps=float(eps))

    cost = pl.CostEstimate(
        flops=10 * N * C * HW,
        transcendentals=N * HW,
        bytes_accessed=2 * N * C * HW * itemsize + 2 * C * itemsize,
    )

    out3 = pl.pallas_call(
        kernel,
        out_shape=jax.ShapeDtypeStruct((N, C, HW), x.dtype),
        grid_spec=pltpu.PrefetchScalarGridSpec(
            num_scalar_prefetch=0,
            grid=grid,
            in_specs=[
                # Batch dim squeezed out of the kernel view; (C, thw) block.
                pl.BlockSpec((None, C, thw), lambda n, s: (n, 0, s)),
                pl.BlockSpec((C, 1), lambda n, s: (0, 0)),
                pl.BlockSpec((C, 1), lambda n, s: (0, 0)),
            ],
            out_specs=pl.BlockSpec((None, C, thw), lambda n, s: (n, 0, s)),
        ),
        compiler_params=pltpu.CompilerParams(
            dimension_semantics=("parallel", "parallel"),
            vmem_limit_bytes=vmem_limit_bytes,
        ),
        cost_estimate=cost,
    )(x3, w2, b2)

    return out3.reshape(N, C, H, W)


def layernorm_channels_first_ref(x, weight, bias, eps=1e-6):
    """Pure-JAX reference mirroring the PyTorch forward (channels_first branch), in f32."""
    xf = x.astype(jnp.float32)
    mean = jnp.mean(xf, axis=1, keepdims=True)
    var = jnp.mean((xf - mean) ** 2, axis=1, keepdims=True)
    xn = (xf - mean) / jnp.sqrt(var + eps)
    w = weight.astype(jnp.float32)[None, :, None, None]
    b = bias.astype(jnp.float32)[None, :, None, None]
    return w * xn + b


if __name__ == "__main__":
    key = jax.random.PRNGKey(0)
    kx, kw, kb, kx2, kx3, kw3, kb3, kx4, kw4, kb4 = jax.random.split(key, 10)

    # --- Main case (matches the module's defaults): f32, N=2, C=4, 16x16 ---
    N, C, H, W = 2, 4, 16, 16
    x = jax.random.normal(kx, (N, C, H, W), dtype=jnp.float32)
    weight = jnp.ones((C,), dtype=jnp.float32) + 0.1 * jax.random.normal(kw, (C,), dtype=jnp.float32)
    bias = 0.1 * jax.random.normal(kb, (C,), dtype=jnp.float32)

    out = jax.block_until_ready(layernorm_channels_first(x, weight, bias, eps=1e-6))
    ref = layernorm_channels_first_ref(x, weight, bias, eps=1e-6)
    assert out.shape == (N, C, H, W)
    assert jnp.allclose(out, ref, atol=1e-5, rtol=1e-5), "mismatch vs reference (f32, even shape)"

    # --- Spatial extent not a multiple of 128: cdiv grid + padded tail block ---
    x2 = jax.random.normal(kx2, (1, C, 13, 13), dtype=jnp.float32)
    out2 = jax.block_until_ready(layernorm_channels_first(x2, weight, bias, eps=1e-6))
    ref2 = layernorm_channels_first_ref(x2, weight, bias, eps=1e-6)
    assert jnp.allclose(out2, ref2, atol=1e-5, rtol=1e-5), "mismatch vs reference (tail shape)"

    # --- Odd channel count (sublane padding on the reduction axis) ---
    C3 = 5
    x3 = jax.random.normal(kx3, (2, C3, 16, 16), dtype=jnp.float32)
    w3 = jnp.ones((C3,), jnp.float32) + 0.1 * jax.random.normal(kw3, (C3,), jnp.float32)
    b3 = 0.1 * jax.random.normal(kb3, (C3,), jnp.float32)
    out3 = jax.block_until_ready(layernorm_channels_first(x3, w3, b3, eps=1e-6))
    ref3 = layernorm_channels_first_ref(x3, w3, b3, eps=1e-6)
    assert jnp.allclose(out3, ref3, atol=1e-5, rtol=1e-5), "mismatch vs reference (odd C)"

    # --- bf16 input (packed-dtype sublane path; math stays in f32) ---
    C4 = 16
    x4 = jax.random.normal(kx4, (2, C4, 32, 32), dtype=jnp.float32).astype(jnp.bfloat16)
    w4 = (jnp.ones((C4,), jnp.float32) + 0.1 * jax.random.normal(kw4, (C4,), jnp.float32)).astype(jnp.bfloat16)
    b4 = (0.1 * jax.random.normal(kb4, (C4,), jnp.float32)).astype(jnp.bfloat16)
    out4 = jax.block_until_ready(layernorm_channels_first(x4, w4, b4, eps=1e-6))
    ref4 = layernorm_channels_first_ref(x4, w4, b4, eps=1e-6)
    assert out4.dtype == jnp.bfloat16
    assert jnp.allclose(out4.astype(jnp.float32), ref4, atol=5e-2, rtol=5e-2), "mismatch vs reference (bf16)"

    print("KERNEL_OK")
</pallas_src>

<mosaic_0001>
module attributes {stable_mosaic.version = 11 : i64} {
  func.func @_ln_cf_kernel(%arg0: i32, %arg1: i32, %arg2: memref<1x4x128xf32, #tpu.memory_space<vmem>>, %arg3: memref<4x1xf32, #tpu.memory_space<vmem>>, %arg4: memref<4x1xf32, #tpu.memory_space<vmem>>, %arg5: memref<1x4x128xf32, #tpu.memory_space<vmem>>) attributes {dimension_semantics = [#tpu.dimension_semantics<parallel>, #tpu.dimension_semantics<parallel>], iteration_bounds = array<i64: 2, 2>, scalar_prefetch = 0 : i64, scratch_operands = 0 : i64, tpu.core_type = #tpu.core_type<tc>, window_params = [{transform_indices = @transform_0, window_bounds = array<i64: 1, 4, 128>}, {pipeline_mode = #tpu.pipeline_mode<synchronous>, transform_indices = @transform_1, window_bounds = array<i64: 4, 1>}, {pipeline_mode = #tpu.pipeline_mode<synchronous>, transform_indices = @transform_2, window_bounds = array<i64: 4, 1>}, {transform_indices = @transform_3, window_bounds = array<i64: 1, 4, 128>}]} {
    %c0 = arith.constant 0 : index
    %c0_0 = arith.constant 0 : index
    %c0_1 = arith.constant 0 : index
    %0 = vector.load %arg2[%c0, %c0_0, %c0_1] : memref<1x4x128xf32, #tpu.memory_space<vmem>>, vector<1x4x128xf32>
    %1 = vector.shape_cast %0 : vector<1x4x128xf32> to vector<4x128xf32>
    %cst = arith.constant dense<0.000000e+00> : vector<128xf32>
    %2 = vector.multi_reduction <add>, %1, %cst [0] : vector<4x128xf32> to vector<128xf32>
    %3 = vector.shape_cast %2 : vector<128xf32> to vector<1x128xf32>
    %cst_2 = arith.constant 4.000000e+00 : f32
    %4 = vector.broadcast %cst_2 : f32 to vector<1x128xf32>
    %5 = arith.divf %3, %4 : vector<1x128xf32>
    %6 = vector.broadcast %5 : vector<1x128xf32> to vector<4x128xf32>
    %7 = arith.subf %1, %6 : vector<4x128xf32>
    %8 = arith.mulf %7, %7 : vector<4x128xf32>
    %cst_3 = arith.constant dense<0.000000e+00> : vector<128xf32>
    %9 = vector.multi_reduction <add>, %8, %cst_3 [0] : vector<4x128xf32> to vector<128xf32>
    %10 = vector.shape_cast %9 : vector<128xf32> to vector<1x128xf32>
    %cst_4 = arith.constant 4.000000e+00 : f32
    %11 = vector.broadcast %cst_4 : f32 to vector<1x128xf32>
    %12 = arith.divf %10, %11 : vector<1x128xf32>
    %cst_5 = arith.constant 9.99999997E-7 : f32
    %13 = vector.broadcast %cst_5 : f32 to vector<1x128xf32>
    %14 = arith.addf %12, %13 : vector<1x128xf32>
    %15 = math.rsqrt %14 : vector<1x128xf32>
    %c0_6 = arith.constant 0 : index
    %c0_7 = arith.constant 0 : index
    %16 = vector.load %arg3[%c0_6, %c0_7] : memref<4x1xf32, #tpu.memory_space<vmem>>, vector<4x1xf32>
    %c0_8 = arith.constant 0 : index
    %c0_9 = arith.constant 0 : index
    %17 = vector.load %arg4[%c0_8, %c0_9] : memref<4x1xf32, #tpu.memory_space<vmem>>, vector<4x1xf32>
    %18 = vector.broadcast %5 : vector<1x128xf32> to vector<4x128xf32>
    %19 = arith.subf %1, %18 : vector<4x128xf32>
    %20 = vector.broadcast %15 : vector<1x128xf32> to vector<4x128xf32>
    %21 = arith.mulf %19, %20 : vector<4x128xf32>
    %22 = vector.broadcast %16 : vector<4x1xf32> to vector<4x128xf32>
    %23 = arith.mulf %21, %22 : vector<4x128xf32>
    %24 = vector.broadcast %17 : vector<4x1xf32> to vector<4x128xf32>
    %25 = arith.addf %23, %24 : vector<4x128xf32>
    %c0_10 = arith.constant 0 : index
    %c0_11 = arith.constant 0 : index
    %c0_12 = arith.constant 0 : index
    %26 = vector.load %arg5[%c0_10, %c0_11, %c0_12] : memref<1x4x128xf32, #tpu.memory_space<vmem>>, vector<1x4x128xf32>
    %27 = vector.shape_cast %26 : vector<1x4x128xf32> to vector<4x128xf32>
    %28 = vector.shape_cast %25 : vector<4x128xf32> to vector<1x4x128xf32>
    tpu.vector_store %arg5[%c0_10, %c0_11, %c0_12], %28 {strides = array<i32>} : memref<1x4x128xf32, #tpu.memory_space<vmem>>, vector<1x4x128xf32>,
    return
  }
  func.func @transform_0(%arg0: i32, %arg1: i32) -> (i32, i32, i32) {
    %c0_i32 = arith.constant 0 : i32
    %c0_i32_0 = arith.constant 0 : i32
    return %arg0, %c0_i32, %arg1 : i32, i32, i32
  }
  func.func @transform_1(%arg0: i32, %arg1: i32) -> (i32, i32) {
    %c0_i32 = arith.constant 0 : i32
    %c0_i32_0 = arith.constant 0 : i32
    %c0_i32_1 = arith.constant 0 : i32
    return %c0_i32, %c0_i32_0 : i32, i32
  }
  func.func @transform_2(%arg0: i32, %arg1: i32) -> (i32, i32) {
    %c0_i32 = arith.constant 0 : i32
    %c0_i32_0 = arith.constant 0 : i32
    %c0_i32_1 = arith.constant 0 : i32
    return %c0_i32, %c0_i32_0 : i32, i32
  }
  func.func @transform_3(%arg0: i32, %arg1: i32) -> (i32, i32, i32) {
    %c0_i32 = arith.constant 0 : i32
    %c0_i32_0 = arith.constant 0 : i32
    return %arg0, %c0_i32, %arg1 : i32, i32, i32
  }
}

</mosaic_0001>

<bundles_post_ra>
// kernel: tpu_custom_call.1
= control target key start
LH: loop header
LB: loop body
LE: loop exit
PB: predicated region body
PF: predicated region fallthrough
CT: control target
= control target key end

     0   :  { %8 = vsyncpa [#allocation3], 0  ;;  %s798_s0 = inlined_call_operand.hbm [shape: f32[2,4,256], index: 0, kind: input, shape index: {}]   ;;  %s799_s1 = inlined_call_operand.vmem [shape: f32[4,1], index: 1, kind: input, shape index: {}]   ;;  %s800_s2 = inlined_call_operand.vmem [shape: f32[4,1], index: 2, kind: input, shape index: {}]   ;;  %s801_s3 = inlined_call_operand.hbm [shape: f32[2,4,256], index: 3, kind: output, shape index: {}]  }
   0x1   :  { %10 = vsyncpa [#allocation3 + $0x1], 0 }
   0x2   :  { %11 = vsyncpa [#allocation4], 0 }
   0x3   :  { %13 = vsyncpa [#allocation4 + $0x1], 0  ;;  %s594_s12 = smov 0   ;;  %s596_s13 = smov 0  }
   0x4   :  { %s598_s14 = smov 0   ;;  %s600_s15 = smov 0  }
   0x5   :  { %s602_s16 = smov 0   ;;  %s604_s17 = smov 0  }
   0x6   :  { %s606_s18 = smov 0   ;;  %s608_s19 = smov 0  }
   0x7 LB: > { %s344_s20 = sadd.s32 4294967295, %s569_s19   ;;  %s345_s21 = sadd.s32 4294967294, %s569_s19   ;;  %s569_s19 = sphi %s608_s19, %s19_s19   ;;  %s565_s18 = sphi %s606_s18, %s818_s18   ;;  %s561_s17 = sphi %s604_s17, %s817_s17   ;;  %s557_s16 = sphi %s602_s16, %s816_s16   ;;  %s553_s15 = sphi %s600_s15, %s815_s15   ;;  %s549_s14 = sphi %s598_s14, %s814_s14   ;;  %s545_s13 = sphi %s596_s13, %s813_s13   ;;  %s541_s12 = sphi %s594_s12, %s812_s12  }
   0x8   : > { %s28_s22 = sadd.s32 1, %s561_s17  ;;  %s31_s23 = sadd.s32 1, %s565_s18 }
   0x9   : > { %p29_p0 = scmp.ge.s32.totalorder %s28_s22, 2  ;;  %s40_s24 = sadd.s32 1, %s549_s14 }
   0xa   : > { %p47_p1 = scmp.ne.s32.totalorder %s549_s14, %s545_s13  ;;  %p48_p2 = scmp.eq.s32.totalorder %s569_s19, 0 }
   0xb   : > { %s820_s22 = smov (%p29_p0, %s28_s22), 0  ;;  %s822_s23 = smov (!%p29_p0, %s31_s23), %s565_s18 }
   0xc   : > { %s36_s25 = ssub.s32 %s561_s17, %s820_s22  ;;  %p647_p3 = por %p48_p2, %p47_p1 }
   0xd   : > { %p33_p4 = scmp.ge.s32.totalorder %s822_s23, 2  ;;  %p53_p5 = scmp.ne.s32.totalorder %s545_s13, %s541_s12 }
   0xe   : > { %p54_p6 = scmp.eq.s32.totalorder %s344_s20, 0  ;;  %p121_p7 = scmp.eq.s32.totalorder %s344_s20, 3 }
   0xf   : > { %s824_s23 = smov (%p33_p4, %s822_s23), 0  ;;  %p127_p10 = scmp.eq.s32.totalorder %s345_s21, 3 }
  0x10   : > { %p655_p8 = por %p54_p6, %p53_p5  ;;  %p659_p9 = por %p121_p7, %p47_p1 }
  0x11   : > { %s35_s29 = ssub.s32 %s565_s18, %s824_s23  ;;  %p665_p12 = por %p127_p10, %p53_p5 }
  0x12   : > { %s805_s28 = scalar_select %p659_p9, 1, 0 }
  0x13   : > { %s37_s30 = sor.u32 %s36_s25, %s35_s29  ;;  %p371_p13 = scmp.lt.s32.totalorder %s569_s19, 4 }
  0x14   : > { %p38_p11 = scmp.eq.s32.totalorder %s37_s30, 0  ;;  %s153_s5 = sand.u32 1, %s549_s14  }
  0x15   : > { %s806_s4 = scalar_select %p665_p12, 1, 0 }
  0x16   : > { %s672_s6 = scalar_select %p38_p11, %s549_s14, %s40_s24  }
  0x17   : > { %s348_s7 = sshll.u32 %s153_s5, 2  ;;  %s349_s8 = sshll.u32 %s565_s18, 1 }
  0x18   : > { %s162_s9 = sadd.s32 %s561_s17, %s349_s8  ;;  %s157_s10 = scalar_lea.vmem [#allocation2], %s348_s7 }
  0x19   : > { %s166_s11 = sshll.u32 %s157_s10, 4  ;;  %s350_s20 = sshll.u32 %s162_s9, 6  ;;  %s676_s11 = int_to_ptr.vmem [resolvable:$true] %s166_s11 }
  0x1a   : > { %s681_s29 = scalar_lea.hbm %s798_s0, %s350_s20  ;;  %p685_p0 = pnand %p371_p13, %p647_p3 }
  0x1b   : > { %s154_s30 = scalar_lea.sflag [#allocation3], %s153_s5  ;;  %s441_s7 = scalar_lea.hbm %s681_s29, 64 }
  0x1c   : > { %p442_p4 = scmp.ne.s32.totalorder %s681_s29, %s441_s7  ;;  %p443_p5 = pneg %p685_p0 }
  0x1d   : > { %s446_s9 = scalar_lea.hbm %s798_s0, 256  ;;  %p447_p3 = scmp.lt.u32.totalorder %s681_s29, %s798_s0 }
  0x1e   : > { %p444_p6 = pnand %p443_p5, %p442_p4  ;;  %p448_p10 = scmp.lt.u32.totalorder %s446_s9, %s441_s7 }
  0x1f   : > { %p450_p13 = scmp.lt.u32.totalorder %s441_s7, %s681_s29 }
  0x20   : > { %p445_p7 = pneg %p444_p6  ;;  %p449_p11 = por %p448_p10, %p447_p3 }
  0x22   : > { %p451_p1 = por %p450_p13, %p449_p11 }
  0x24   : > { %p452_p2 = pnand %p451_p1, %p445_p7 }
  0x26   : > { %455 = shalt.err (!%p452_p2)
}
  0x27   : > { %s456_s5 = scalar_lea.vmem %s676_s11, 64  ;;  %s571_s21 = smov [#allocation2]  }
  0x28   : > { %p457_p4 = scmp.ne.s32.totalorder %s676_s11, %s456_s5  ;;  %s461_s25 = sshll.u32 %s571_s21, 4  ;;  %s462_s25 = int_to_ptr.vmem [resolvable:$false] %s461_s25 }
  0x29   : > { %s463_s26 = scalar_lea.vmem %s462_s25, 128  ;;  %p464_p9 = scmp.lt.s32.totalorder %s676_s11, %s462_s25 }
  0x2a   : > { %p459_p6 = pnand %p457_p4, %p443_p5  ;;  %p465_p3 = scmp.lt.s32.totalorder %s463_s26, %s456_s5 }
  0x2c   : > { %p460_p12 = pneg %p459_p6  ;;  %p466_p10 = por %p465_p3, %p464_p9 }
  0x2e   : > { %p467_p11 = pnand %p466_p10, %p460_p12 }
  0x30   : > { %470 = shalt.err (!%p467_p11)
}
  0x31   : > { %366 = dma.hbm_to_vmem [thread:$0]  (!%p685_p0), %s681_s29, 64, %s676_s11, %s154_s30  }
  0x32   : > { %p808_p1 = scmp.lt.s32.totalorder %s569_s19, 5  ;;  %p809_p2 = scmp.ge.s32.totalorder %s569_s19, 1 }
  0x34   : > { %p172_p5 = pnand %p809_p2, %p808_p1 }
  0x35   : > { %s721_s7 = sand.u32 (!%p172_p5), 1, %s545_s13  }
  0x36   : > { %175 = sbr.rel (%p172_p5) target bundleno = 212 (0xd4), region = 32  ;;  %s352_s8 = sshll.u32 (!%p172_p5), %s721_s7, 2 }
  0x37   : > { %s178_s9 = scalar_lea.sflag (!%p172_p5), [#allocation3], %s721_s7  ;;  %s181_s24 = scalar_lea.vmem (!%p172_p5), [#allocation2], %s352_s8 }
  0x3d   : > { %532 = dma.done.wait (%p655_p8), %s178_s9, 64  }
  0x3e   : > { %534 = vsyncadd (%p655_p8), %s178_s9, 4294967232  ;;  %v572_v0 = vmov 0   ;;  %v227_v1 = vld [vmem:[%s799_s1] sm:$0xf]  ;;  %vm205_vm0 = vcmask 1043456   ;;  %s355_s27 = sshll.u32 %s557_s16, 1 }
  0x3f   : > { %438 = vset.pattern.permute.xlu0 %v572_v0  ;;  %v228_v2 = vld [vmem:[%s800_s2] sm:$0xf]  ;;  %s255_s20 = sadd.s32 %s553_s15, %s355_s27  ;;  %s203_s21 = scalar_lea.vmem [#allocation5], %s352_s8 }
  0x40   : > { %232 = vperm.xlu0 %438, %v227_v1   ;;  %v204_v3 = vld [vmem:[%s181_s24] sm:$0xf]  ;;  %s356_s5 = sshll.u32 %s255_s20, 6  ;;  %s259_s25 = sshll.u32 %s203_s21, 4  ;;  %s746_s25 = int_to_ptr.vmem [resolvable:$true] %s259_s25 }
  0x41   : > { %v206_v4 = vsel %vm205_vm0, %v204_v3, 0.0  ;;  %s744_s24 = scalar_lea.hbm %s801_s3, %s356_s5  ;;  %s244_s15 = scalar_lea.sflag [#allocation4], %s721_s7 }
  0x42   : > { %v207_v5 = vrot.slane %v206_v4, 4  ;;  %s471_s16 = scalar_lea.vmem %s746_s25, 64  ;;  %p810_p9 = scmp.ne.s32.totalorder %s805_s28, 0 }
  0x43   : > { %p472_p8 = scmp.ne.s32.totalorder %s746_s25, %s471_s16  ;;  %s573_s8 = smov [#allocation5]  }
  0x44   : > { %238 = vperm.xlu0 %438, %v228_v2   ;;  %v208_v6 = vadd.f32 %v207_v5, %v206_v4  ;;  %s475_s11 = sshll.u32 %s573_s8, 4  ;;  %s476_s11 = int_to_ptr.vmem [resolvable:$false] %s475_s11 }
  0x45   : > { %p473_p12 = pnand %p472_p8, %p810_p9  ;;  %s477_s29 = scalar_lea.vmem %s476_s11, 128 }
  0x46   : > { %v209_v7 = vrot.slane %v208_v6, 2  ;;  %p478_p7 = scmp.lt.s32.totalorder %s746_s25, %s476_s11  ;;  %p479_p13 = scmp.lt.s32.totalorder %s477_s29, %s471_s16 }
  0x47   : > { %p474_p0 = pneg %p473_p12 }
  0x48   : > { %v210_v8 = vadd.f32 %v209_v7, %v208_v6  ;;  %p480_p4 = por %p479_p13, %p478_p7 }
  0x4a   : > { %v211_v9 = vrot.slane %v210_v8, 1  ;;  %p481_p6 = pnand %p480_p4, %p474_p0 }
  0x4c   : > { %v212_v10 = vadd.f32 %v211_v9, %v210_v8 }
  0x4e   : > { %v214_v11 = vmul.f32 0.25, %v212_v10 }
  0x50   : > { %v215_v12 = vsub.f32 %v204_v3, %v214_v11 }
  0x52   : > { %v216_v13 = vmul.f32 %v215_v12, %v215_v12 }
  0x54   : > { %v217_v14 = vsel %vm205_vm0, %v216_v13, 0.0 }
  0x55   : > { %v218_v15 = vrot.slane %v217_v14, 4 }
  0x57   : > { %v219_v16 = vadd.f32 %v218_v15, %v217_v14 }
  0x59   : > { %v220_v17 = vrot.slane %v219_v16, 2 }
  0x5b   : > { %v221_v18 = vadd.f32 %v220_v17, %v219_v16 }
  0x5d   : > { %v222_v19 = vrot.slane %v221_v18, 1 }
  0x5f   : > { %v223_v20 = vadd.f32 %v222_v19, %v221_v18 }
  0x61   : > { %v224_v21 = vmul.f32 0.25, %v223_v20 }
  0x63   : > { %v225_v22 = vadd.f32 1e-06, %v224_v21 }
  0x65   : > { %439 = vrsqrt.f32 %v225_v22 }
  0x6f   : > { %v440_v23 = vpop.eup %439 }
  0x70   : > { %v229_v24 = vmul.f32 %v440_v23, %v215_v12 }
  0xbf   : > { %v233_v25 = vpop.permute.xlu0 %232 }
  0xc0   : > { %v235_v26 = vmul.f32 %v233_v25, %v229_v24 }
  0xc3   : > { %v239_v27 = vpop.permute.xlu0 %238 }
  0xc4   : > { %v241_v28 = vadd.f32 %v239_v27, %v235_v26 }
  0xc6   : > { %242 = vst [vmem:[%s203_s21] sm:$0xf] %v241_v28 }
  0xc7   : > { %484 = shalt.err (!%p481_p6)
}
  0xc8   : > { %s485_s7 = scalar_lea.hbm %s744_s24, 64  ;;  %s489_s27 = scalar_lea.hbm %s801_s3, 256 }
  0xc9   : > { %p486_p3 = scmp.ne.s32.totalorder %s744_s24, %s485_s7  ;;  %p490_p1 = scmp.lt.u32.totalorder %s744_s24, %s801_s3 }
  0xca   : > { %p491_p2 = scmp.lt.u32.totalorder %s489_s27, %s485_s7  ;;  %p493_p8 = scmp.lt.u32.totalorder %s485_s7, %s744_s24 }
  0xcb   : > { %p487_p10 = pnand %p486_p3, %p810_p9 }
  0xcc   : > { %p492_p5 = por %p491_p2, %p490_p1 }
  0xcd   : > { %p488_p11 = pneg %p487_p10 }
  0xce   : > { %p494_p12 = por %p493_p8, %p492_p5 }
  0xd0   : > { %p495_p0 = pnand %p494_p12, %p488_p11 }
  0xd2   : > { %498 = shalt.err (!%p495_p0)
}
  0xd3   : > { %361 = dma.vmem_to_hbm [thread:$0]  (%p810_p9), %s746_s25, 64, %s744_s24, %s244_s15  }
  0xd4 PF: > { %p372_p7 = scmp.ge.s32.totalorder %s569_s19, 2  ;;  %s271_s21 = sand.u32 1, %s541_s12  }
  0xd5   : > { %p811_p13 = scmp.ne.s32.totalorder %s806_s4, 0  ;;  %s272_s26 = scalar_lea.sflag [#allocation4], %s271_s21 }
  0xd7   : > { %p368_p4 = pnand %p372_p7, %p811_p13 }
  0xd9   : > { %536 = dma.done.wait (!%p368_p4), %s272_s26, 64  }
  0xda   : > { %538 = vsyncadd (!%p368_p4), %s272_s26, 4294967232  ;;  %s19_s19 = sadd.s32 1, %s569_s19   ;;  %s812_s12 = smov %s545_s13 }
  0xdb   : > { %p16_p6 = scmp.ge.s32.totalorder %s19_s19, 6   ;;  %s813_s13 = smov %s549_s14 }
  0xdc   : > { %s814_s14 = smov %s672_s6  ;;  %s815_s15 = smov %s561_s17 }
  0xdd   : > { %s816_s16 = smov %s565_s18  ;;  %s817_s17 = smov %s820_s22 }
  0xde   : > { %s818_s18 = smov %s824_s23  ;;  %18 = sbr.rel (!%p16_p6) target bundleno = 7 (0x7), region = 77 }
  0xe5   :  { %277 = vsyncpa [#allocation3], 1 }
  0xe6   :  { %279 = vsyncpa [#allocation3 + $0x1], 1 }
  0xe7   :  { %280 = vsyncpa [#allocation4], 1 }
  0xe8   :  { %282 = vsyncpa [#allocation4 + $0x1], 1 }

</bundles_post_ra>
